<compile_context>
chip_gen: v5e
topology: v5e:2x2
jax: 0.10.0
libtpu: 0.0.40
codegen_flags: <defaults>
</compile_context>

<pallas_src>
import functools
import math

import jax
import jax.numpy as jnp
from jax.experimental import pallas as pl
from jax.experimental.pallas import tpu as pltpu


def _round_up(v, m):
    return ((v + m - 1) // m) * m


def _vmem_limit_bytes():
    """Generation-aware scoped-VMEM limit (~96 MiB v5e/v6e, ~48 MiB v7x)."""
    cap = 64 * 1024 * 1024  # conservative fallback (v7x physical per TC)
    try:
        info = pltpu.get_tpu_info()
        cap = int(getattr(info, "vmem_capacity_bytes", cap) or cap)
    except Exception:
        pass
    return max(32 * 1024 * 1024, min(int(cap * 0.75), 100 * 1024 * 1024))


def _pick_tile(dim, candidates):
    """Largest candidate that divides `dim`; fall back to full extent."""
    for c in candidates:
        if dim >= c and dim % c == 0:
            return c
    return dim


def _pick_tm(m, max_tm):
    """Row tile: multiple of 8 (or the full extent), and >= 2 blocks along M
    whenever possible so the 'parallel' axis can shard across both v7x TCs."""
    if m <= 8:
        return m                      # full extent (valid for any m)
    if m <= max_tm:
        return max(8, _round_up((m + 1) // 2, 8))
    return max_tm


def _sigmoid_exact(acc_f32):
    # Exact sigmoid, f32, epilogue-only (exp rides the EUP slot; the divide is
    # once per output element so exactness is essentially free).
    return 1.0 / (1.0 + jnp.exp(-acc_f32))


# ----------------------------------------------------------------------------
# Fused stack kernel (group of consecutive layers resident in VMEM)
# ----------------------------------------------------------------------------
def _fused_mlp_kernel(*refs, num_layers, has_bias):
    # refs = (x_ref, w0[, b0], w1[, b1], ..., o_ref)
    x_ref = refs[0]
    o_ref = refs[-1]
    params = refs[1:-1]

    h = x_ref[...]
    idx = 0
    for layer in range(num_layers):
        w = params[idx][...]                     # bf16 weight tile
        idx += 1
        acc = jnp.dot(h.astype(jnp.bfloat16), w,
                      preferred_element_type=jnp.float32)
        if has_bias[layer]:
            acc = acc + params[idx][...].astype(jnp.float32)
            idx += 1
        h = _sigmoid_exact(acc)                  # f32
    o_ref[...] = h.astype(o_ref.dtype)


def fused_mlp(x, params, has_bias, *, tm, out_dtype, vmem_limit):
    """x: (M, K0) with K0 a multiple of 128 (or full original width).
    params: list of (w (Kp, Np) bf16, b (1, Np) f32 or None), padded to 128."""
    M, K0 = x.shape
    num_layers = len(params)
    n_last = params[-1][0].shape[1]

    kernel = functools.partial(
        _fused_mlp_kernel, num_layers=num_layers, has_bias=tuple(has_bias)
    )

    in_specs = [pl.BlockSpec((tm, K0), lambda i: (i, 0))]
    args = [x]
    flops = 0
    trans = 0
    bytes_acc = M * K0 * x.dtype.itemsize + M * n_last * jnp.dtype(out_dtype).itemsize
    for (w, b), hb in zip(params, has_bias):
        kp, np_ = w.shape
        in_specs.append(pl.BlockSpec((kp, np_), lambda i: (0, 0)))
        args.append(w)
        bytes_acc += kp * np_ * w.dtype.itemsize
        if hb:
            in_specs.append(pl.BlockSpec((1, np_), lambda i: (0, 0)))
            args.append(b)
            bytes_acc += np_ * 4
        flops += 2 * M * kp * np_
        trans += M * np_

    return pl.pallas_call(
        kernel,
        out_shape=jax.ShapeDtypeStruct((M, n_last), out_dtype),
        grid=(pl.cdiv(M, tm),),
        in_specs=in_specs,
        out_specs=pl.BlockSpec((tm, n_last), lambda i: (i, 0)),
        compiler_params=pltpu.CompilerParams(
            dimension_semantics=("parallel",),
            vmem_limit_bytes=vmem_limit,
        ),
        cost_estimate=pl.CostEstimate(
            flops=int(flops), transcendentals=int(trans), bytes_accessed=int(bytes_acc)
        ),
    )(*args)


# ----------------------------------------------------------------------------
# Tiled single-layer kernel (oversize layers): (M, N, K) grid, f32 accumulation
# ----------------------------------------------------------------------------
def _tiled_linear_kernel(*refs, apply_sigmoid, has_bias, acc_in_out):
    if acc_in_out:
        if has_bias:
            x_ref, w_ref, b_ref, o_ref = refs
        else:
            x_ref, w_ref, o_ref = refs
            b_ref = None
        acc_ref = o_ref                          # f32 output doubles as accumulator
    else:
        if has_bias:
            x_ref, w_ref, b_ref, o_ref, acc_ref = refs
        else:
            x_ref, w_ref, o_ref, acc_ref = refs
            b_ref = None

    k = pl.program_id(2)

    @pl.when(k == 0)
    def _():
        acc_ref[...] = jnp.zeros_like(acc_ref)

    acc_ref[...] += jnp.dot(
        x_ref[...].astype(jnp.bfloat16), w_ref[...],
        preferred_element_type=jnp.float32,
    )

    @pl.when(k == pl.num_programs(2) - 1)
    def _():
        acc = acc_ref[...]
        if has_bias:
            acc = acc + b_ref[...].astype(jnp.float32)
        if apply_sigmoid:
            acc = _sigmoid_exact(acc)
        o_ref[...] = acc.astype(o_ref.dtype)


def pallas_linear_tiled(x, w, b=None, *, apply_sigmoid=True, out_dtype=None,
                        vmem_limit):
    """Tiled Linear(+Sigmoid). x:(M,K), w:(K,N) bf16, b:(1,N) f32 or None.
    K and N are multiples of 128; M is arbitrary (partial last block)."""
    M, K = x.shape
    K2, N = w.shape
    assert K == K2, (K, K2)
    if out_dtype is None:
        out_dtype = x.dtype

    tm = _pick_tm(M, 512)
    tn = _pick_tile(N, (512, 256, 128))
    tk = _pick_tile(K, (1024, 512, 256, 128))
    grid = (pl.cdiv(M, tm), N // tn, K // tk)

    has_bias = b is not None
    acc_in_out = jnp.dtype(out_dtype) == jnp.dtype(jnp.float32)
    kernel = functools.partial(
        _tiled_linear_kernel, apply_sigmoid=apply_sigmoid,
        has_bias=has_bias, acc_in_out=acc_in_out,
    )

    in_specs = [
        pl.BlockSpec((tm, tk), lambda i, j, k: (i, k)),
        pl.BlockSpec((tk, tn), lambda i, j, k: (k, j)),
    ]
    args = [x, w]
    if has_bias:
        in_specs.append(pl.BlockSpec((1, tn), lambda i, j, k: (0, j)))
        args.append(b)

    scratch_shapes = [] if acc_in_out else [pltpu.VMEM((tm, tn), jnp.float32)]

    cost = pl.CostEstimate(
        flops=int(2 * M * K * N),
        transcendentals=int(M * N) if apply_sigmoid else 0,
        bytes_accessed=int(M * K * x.dtype.itemsize + K * N * w.dtype.itemsize
                           + M * N * jnp.dtype(out_dtype).itemsize
                           + (N * 4 if has_bias else 0)),
    )

    return pl.pallas_call(
        kernel,
        out_shape=jax.ShapeDtypeStruct((M, N), out_dtype),
        grid=grid,
        in_specs=in_specs,
        out_specs=pl.BlockSpec((tm, tn), lambda i, j, k: (i, j)),
        scratch_shapes=scratch_shapes,
        compiler_params=pltpu.CompilerParams(
            dimension_semantics=("parallel", "parallel", "arbitrary"),
            vmem_limit_bytes=vmem_limit,
        ),
        cost_estimate=cost,
    )(*args)


# ----------------------------------------------------------------------------
# Module wrapper (PyTorch FC_Layer equivalent)
# ----------------------------------------------------------------------------
class FCLayerPallas:
    """JAX/Pallas equivalent of FC_Layer (Linear + Sigmoid stack)."""

    def __init__(self, input_dim, layer_size, bias=True, key=None,
                 fused_vmem_budget=None):
        if not isinstance(layer_size, (list, tuple)):
            layer_size = [layer_size]
        sizes = [int(input_dim)] + [int(s) for s in layer_size]
        n_layers = len(sizes) - 1
        if not isinstance(bias, (list, tuple)):
            bias = [bias] * n_layers
        assert len(bias) == n_layers

        if key is None:
            key = jax.random.PRNGKey(0)

        self.n_layers = n_layers
        self.in_features = sizes[0]
        self.out_features = sizes[-1]
        self.has_bias = tuple(bool(b) for b in bias)
        self.vmem_limit = _vmem_limit_bytes()
        # Fused budget is checked against 2x weight bytes (Pallas double-buffers
        # every input BlockSpec) plus activation blocks -> safe on v7x 64 MiB.
        self.fused_vmem_budget = (self.vmem_limit // 2 if fused_vmem_budget is None
                                  else fused_vmem_budget)
        # lane-dense padded feature sizes (multiples of 128)
        self._padded_sizes = [_round_up(s, 128) for s in sizes]

        self.params = []  # list of (w_pad (Kp,Np) bf16, b_pad (1,Np) f32 or None)
        for i in range(n_layers):
            fan_in, fan_out = sizes[i], sizes[i + 1]
            kp, np_ = self._padded_sizes[i], self._padded_sizes[i + 1]
            key, wk, bk = jax.random.split(key, 3)
            bound = 1.0 / math.sqrt(fan_in)
            # PyTorch nn.Linear init: U(-1/sqrt(fan_in), 1/sqrt(fan_in)).
            # Stored as (in, out) = transpose of torch's (out, in); zero-padded;
            # bf16 so the MXU runs at its bf16 rate and HBM bytes are halved.
            w = jax.random.uniform(wk, (fan_in, fan_out), jnp.float32, -bound, bound)
            w_pad = (jnp.zeros((kp, np_), jnp.float32)
                     .at[:fan_in, :fan_out].set(w).astype(jnp.bfloat16))
            if self.has_bias[i]:
                b = jax.random.uniform(bk, (fan_out,), jnp.float32, -bound, bound)
                b_pad = jnp.zeros((1, np_), jnp.float32).at[0, :fan_out].set(b)
            else:
                b_pad = None
            self.params.append((w_pad, b_pad))

    def _fused_group_bytes(self, layer_ids, tm):
        wbytes = 0
        max_feat = self.params[layer_ids[0]][0].shape[0]
        for i in layer_ids:
            w, b = self.params[i]
            wbytes += w.size * w.dtype.itemsize
            if b is not None:
                wbytes += b.size * b.dtype.itemsize
            max_feat = max(max_feat, w.shape[1])
        # 2x weights: Pallas double-buffers every input BlockSpec.
        # Activations: in/out blocks (double-buffered) + per-layer f32 temps.
        act = 2 * tm * max_feat * 4 * (len(layer_ids) + 2)
        return 2 * wbytes + act

    def _plan_groups(self, tm):
        """Greedy grouping: consecutive layers that fit VMEM run as one fused
        pallas_call; oversize layers run through the tiled kernel."""
        groups, cur = [], []

        def flush():
            if cur:
                groups.append(("fused", tuple(cur)))
                cur.clear()

        for i in range(self.n_layers):
            if self._fused_group_bytes([i], tm) > self.fused_vmem_budget:
                flush()
                groups.append(("tiled", (i,)))
                continue
            if cur and self._fused_group_bytes(cur + [i], tm) > self.fused_vmem_budget:
                flush()
            cur.append(i)
        flush()
        return groups

    def __call__(self, x, batch_dim=0):
        # forward: x.view(x.size(batch_dim), -1)
        if x.ndim:
            x = x.reshape(x.shape[batch_dim], -1)
        M, K = x.shape
        assert K == self.in_features, (K, self.in_features)

        # Never pad M (cdiv grid + partial last block); pad K only if the
        # in_features aren't already lane-aligned.
        k0_pad = self._padded_sizes[0]
        if K != k0_pad:
            x = jnp.pad(x, ((0, 0), (0, k0_pad - K)))

        tm = _pick_tm(M, 256)
        groups = self._plan_groups(tm)

        h = x
        final_dtype = x.dtype
        for gi, (kind, layer_ids) in enumerate(groups):
            last = gi == len(groups) - 1
            # Intermediate activations between pallas_calls travel as bf16
            # (halves the HBM round-trip); the final output keeps x's dtype.
            out_dtype = final_dtype if last else jnp.bfloat16
            if kind == "fused":
                h = fused_mlp(h,
                              [self.params[i] for i in layer_ids],
                              [self.has_bias[i] for i in layer_ids],
                              tm=tm, out_dtype=out_dtype,
                              vmem_limit=self.vmem_limit)
            else:
                i = layer_ids[0]
                w, b = self.params[i]
                h = pallas_linear_tiled(h, w, b if self.has_bias[i] else None,
                                        apply_sigmoid=True, out_dtype=out_dtype,
                                        vmem_limit=self.vmem_limit)
        return h[:, :self.out_features]


if __name__ == "__main__":
    key = jax.random.PRNGKey(0)
    k_x, k_p = jax.random.split(key)

    # Example input: NCHW tensor (batch=2, channels=4, 16x16 spatial),
    # flattened inside forward to (2, 1024) -> 128 -> 32.
    x = jax.random.normal(k_x, (2, 4, 16, 16), dtype=jnp.float32)
    in_features = 4 * 16 * 16  # 1024

    # Fused-stack path (default: everything fits VMEM -> one pallas_call).
    model = FCLayerPallas(in_features, layer_size=[128, 32], bias=True, key=k_p)
    out_fused = model(x)
    jax.block_until_ready(out_fused)
    assert out_fused.shape == (2, 32), out_fused.shape
    assert bool(jnp.all(jnp.isfinite(out_fused)))
    assert bool(jnp.all((out_fused >= 0.0) & (out_fused <= 1.0)))

    # Exercise the tiled per-layer fallback on the same weights (budget = 0).
    model_tiled = FCLayerPallas(in_features, layer_size=[128, 32], bias=True,
                                key=k_p, fused_vmem_budget=0)
    out_tiled = model_tiled(x)
    jax.block_until_ready(out_tiled)
    assert out_tiled.shape == (2, 32), out_tiled.shape

    # Pure-JAX reference using the same bf16 weights with f32 accumulation.
    h_ref = x.reshape(2, -1)
    for (w_pad, b_pad), (fi, fo) in zip(model.params, [(1024, 128), (128, 32)]):
        acc = jnp.dot(h_ref.astype(jnp.bfloat16).astype(jnp.float32),
                      w_pad[:fi, :fo].astype(jnp.float32))
        if b_pad is not None:
            acc = acc + b_pad[0, :fo]
        h_ref = jax.nn.sigmoid(acc)
    assert jnp.allclose(out_fused, h_ref, atol=1e-2), "fused kernel mismatch"
    assert jnp.allclose(out_tiled, h_ref, atol=1e-2), "tiled kernel mismatch"
    assert jnp.allclose(out_fused, out_tiled, atol=1e-2)

    print("KERNEL_OK")
</pallas_src>

<mosaic_0001>
module attributes {stable_mosaic.version = 11 : i64} {
  func.func @_fused_mlp_kernel(%arg0: i32, %arg1: memref<2x1024xf32, #tpu.memory_space<vmem>>, %arg2: memref<1024x128xbf16, #tpu.memory_space<vmem>>, %arg3: memref<1x128xf32, #tpu.memory_space<vmem>>, %arg4: memref<128x128xbf16, #tpu.memory_space<vmem>>, %arg5: memref<1x128xf32, #tpu.memory_space<vmem>>, %arg6: memref<2x128xf32, #tpu.memory_space<vmem>>) attributes {dimension_semantics = [#tpu.dimension_semantics<parallel>], iteration_bounds = array<i64: 1>, scalar_prefetch = 0 : i64, scratch_operands = 0 : i64, tpu.core_type = #tpu.core_type<tc>, window_params = [{transform_indices = @transform_0, window_bounds = array<i64: 2, 1024>}, {pipeline_mode = #tpu.pipeline_mode<synchronous>, transform_indices = @transform_1, window_bounds = array<i64: 1024, 128>}, {pipeline_mode = #tpu.pipeline_mode<synchronous>, transform_indices = @transform_2, window_bounds = array<i64: 1, 128>}, {pipeline_mode = #tpu.pipeline_mode<synchronous>, transform_indices = @transform_3, window_bounds = array<i64: 128, 128>}, {pipeline_mode = #tpu.pipeline_mode<synchronous>, transform_indices = @transform_4, window_bounds = array<i64: 1, 128>}, {transform_indices = @transform_5, window_bounds = array<i64: 2, 128>}]} {
    %c0 = arith.constant 0 : index
    %c0_0 = arith.constant 0 : index
    %0 = vector.load %arg1[%c0, %c0_0] : memref<2x1024xf32, #tpu.memory_space<vmem>>, vector<2x1024xf32>
    %c0_1 = arith.constant 0 : index
    %c0_2 = arith.constant 0 : index
    %1 = vector.load %arg2[%c0_1, %c0_2] : memref<1024x128xbf16, #tpu.memory_space<vmem>>, vector<1024x128xbf16>
    %2 = arith.truncf %0 : vector<2x1024xf32> to vector<2x1024xbf16>
    %cst = arith.constant dense<0.000000e+00> : vector<2x128xf32>
    %3 = tpu.matmul %2, %1, %cst {dimension_numbers = #tpu.dot_dimension_numbers<[1], [0], [0], [1], [0, 0, 1, 1], [], []>} : vector<2x1024xbf16>, vector<1024x128xbf16>, vector<2x128xf32> -> vector<2x128xf32>
    %c0_3 = arith.constant 0 : index
    %c0_4 = arith.constant 0 : index
    %4 = vector.load %arg3[%c0_3, %c0_4] : memref<1x128xf32, #tpu.memory_space<vmem>>, vector<1x128xf32>
    %5 = vector.broadcast %4 : vector<1x128xf32> to vector<2x128xf32>
    %6 = arith.addf %3, %5 : vector<2x128xf32>
    %cst_5 = arith.constant 0.000000e+00 : f32
    %7 = vector.broadcast %cst_5 : f32 to vector<2x128xf32>
    %8 = arith.subf %7, %6 : vector<2x128xf32>
    %9 = math.exp %8 : vector<2x128xf32>
    %cst_6 = arith.constant 1.000000e+00 : f32
    %10 = vector.broadcast %cst_6 : f32 to vector<2x128xf32>
    %11 = arith.addf %10, %9 : vector<2x128xf32>
    %cst_7 = arith.constant 1.000000e+00 : f32
    %12 = vector.broadcast %cst_7 : f32 to vector<2x128xf32>
    %13 = arith.divf %12, %11 : vector<2x128xf32>
    %c0_8 = arith.constant 0 : index
    %c0_9 = arith.constant 0 : index
    %14 = vector.load %arg4[%c0_8, %c0_9] : memref<128x128xbf16, #tpu.memory_space<vmem>>, vector<128x128xbf16>
    %15 = arith.truncf %13 : vector<2x128xf32> to vector<2x128xbf16>
    %cst_10 = arith.constant dense<0.000000e+00> : vector<2x128xf32>
    %16 = tpu.matmul %15, %14, %cst_10 {dimension_numbers = #tpu.dot_dimension_numbers<[1], [0], [0], [1], [0, 0, 1, 1], [], []>} : vector<2x128xbf16>, vector<128x128xbf16>, vector<2x128xf32> -> vector<2x128xf32>
    %c0_11 = arith.constant 0 : index
    %c0_12 = arith.constant 0 : index
    %17 = vector.load %arg5[%c0_11, %c0_12] : memref<1x128xf32, #tpu.memory_space<vmem>>, vector<1x128xf32>
    %18 = vector.broadcast %17 : vector<1x128xf32> to vector<2x128xf32>
    %19 = arith.addf %16, %18 : vector<2x128xf32>
    %cst_13 = arith.constant 0.000000e+00 : f32
    %20 = vector.broadcast %cst_13 : f32 to vector<2x128xf32>
    %21 = arith.subf %20, %19 : vector<2x128xf32>
    %22 = math.exp %21 : vector<2x128xf32>
    %cst_14 = arith.constant 1.000000e+00 : f32
    %23 = vector.broadcast %cst_14 : f32 to vector<2x128xf32>
    %24 = arith.addf %23, %22 : vector<2x128xf32>
    %cst_15 = arith.constant 1.000000e+00 : f32
    %25 = vector.broadcast %cst_15 : f32 to vector<2x128xf32>
    %26 = arith.divf %25, %24 : vector<2x128xf32>
    %c0_16 = arith.constant 0 : index
    %c0_17 = arith.constant 0 : index
    %27 = vector.load %arg6[%c0_16, %c0_17] : memref<2x128xf32, #tpu.memory_space<vmem>>, vector<2x128xf32>
    tpu.vector_store %arg6[%c0_16, %c0_17], %26 {strides = array<i32>} : memref<2x128xf32, #tpu.memory_space<vmem>>, vector<2x128xf32>,
    return
  }
  func.func @transform_0(%arg0: i32) -> (i32, i32) {
    %c0_i32 = arith.constant 0 : i32
    %c0_i32_0 = arith.constant 0 : i32
    return %arg0, %c0_i32 : i32, i32
  }
  func.func @transform_1(%arg0: i32) -> (i32, i32) {
    %c0_i32 = arith.constant 0 : i32
    %c0_i32_0 = arith.constant 0 : i32
    %c0_i32_1 = arith.constant 0 : i32
    return %c0_i32, %c0_i32_0 : i32, i32
  }
  func.func @transform_2(%arg0: i32) -> (i32, i32) {
    %c0_i32 = arith.constant 0 : i32
    %c0_i32_0 = arith.constant 0 : i32
    %c0_i32_1 = arith.constant 0 : i32
    return %c0_i32, %c0_i32_0 : i32, i32
  }
  func.func @transform_3(%arg0: i32) -> (i32, i32) {
    %c0_i32 = arith.constant 0 : i32
    %c0_i32_0 = arith.constant 0 : i32
    %c0_i32_1 = arith.constant 0 : i32
    return %c0_i32, %c0_i32_0 : i32, i32
  }
  func.func @transform_4(%arg0: i32) -> (i32, i32) {
    %c0_i32 = arith.constant 0 : i32
    %c0_i32_0 = arith.constant 0 : i32
    %c0_i32_1 = arith.constant 0 : i32
    return %c0_i32, %c0_i32_0 : i32, i32
  }
  func.func @transform_5(%arg0: i32) -> (i32, i32) {
    %c0_i32 = arith.constant 0 : i32
    %c0_i32_0 = arith.constant 0 : i32
    return %arg0, %c0_i32 : i32, i32
  }
}

</mosaic_0001>

<bundles_post_ra>
// kernel: tpu_custom_call.1
= control target key start
LH: loop header
LB: loop body
LE: loop exit
PB: predicated region body
PF: predicated region fallthrough
CT: control target
= control target key end

     0   :  { %10 = vsyncpa [#allocation3], 0  ;;  %s1388_s0 = inlined_call_operand.hbm [shape: f32[2,1024], index: 0, kind: input, shape index: {}]   ;;  %s1389_s1 = inlined_call_operand.hbm [shape: bf16[1024,128], index: 1, kind: input, shape index: {}]   ;;  %s1390_s2 = inlined_call_operand.vmem [shape: f32[1,128], index: 2, kind: input, shape index: {}]   ;;  %s1391_s3 = inlined_call_operand.hbm [shape: bf16[128,128], index: 3, kind: input, shape index: {}]   ;;  %s1392_s4 = inlined_call_operand.vmem [shape: f32[1,128], index: 4, kind: input, shape index: {}]   ;;  %s1393_s5 = inlined_call_operand.hbm [shape: f32[2,128], index: 5, kind: output, shape index: {}]  }
   0x1   :  { %11 = vsyncpa [#allocation6], 0  ;;  %s28_s20 = sshll.u32 %s1389_s1, 4  ;;  %s29_s20 = int_to_ptr.hbm [resolvable:$true] %s28_s20 }
   0x2   :  { %12 = vsyncpa [#allocation4], 0  ;;  %s1334_s21 = smov [#allocation5]   ;;  %s18_s25 = sshll.u32 %s1388_s0, 4  ;;  %s19_s25 = int_to_ptr.hbm [resolvable:$true] %s18_s25 }
   0x3   :  { %s30_s22 = sshll.u32 %s1334_s21, 4  ;;  %s1335_s26 = smov 64   ;;  %s31_s22 = int_to_ptr.vmem [resolvable:$true] %s30_s22 }
   0x4   :  { %s1336_s27 = smov 4   ;;  %s1337_s28 = smov [#allocation2]  }
   0x5   :  { %36 = dma.hbm_to_vmem [thread:$0]  %s29_s20, 8192, %s31_s22, [#allocation6], %s1335_s26, %s1335_s26, %s1336_s27  }
   0x6   :  { %s20_s29 = sshll.u32 %s1337_s28, 4  ;;  %s43_s7 = sshll.u32 %s1391_s3, 4  ;;  %s21_s29 = int_to_ptr.vmem [resolvable:$true] %s20_s29  ;;  %s44_s7 = int_to_ptr.hbm [resolvable:$true] %s43_s7 }
   0x7   :  { %23 = dma.hbm_to_vmem [thread:$0]  %s19_s25, 256, %s21_s29, [#allocation3]  }
   0x8   :  { %s1338_s1 = smov [#allocation7]  }
   0x9   :  { %s45_s8 = sshll.u32 %s1338_s1, 4  ;;  %s46_s8 = int_to_ptr.vmem [resolvable:$true] %s45_s8 }
   0xa   :  { %51 = dma.hbm_to_vmem [thread:$0]  %s44_s7, 1024, %s46_s8, [#allocation6], %s1335_s26, %s1335_s26, %s1336_s27  }
   0xb   :  { %1328 = dma.done.wait [#allocation3], 256  }
   0xc   :  { %1329 = vsyncadd [#allocation3], 4294967040 }
   0xd   :  { %1330 = dma.done.wait [#allocation6], 9216  }
   0xe   :  { %1331 = vsyncadd [#allocation6], 4294958080  ;;  %v1151_v0 = vld [vmem:[#allocation5 + $0x38] sm:$0xff]  ;;  %v1150_v4 = vld [vmem:[#allocation5 + $0x30] sm:$0xff]  ;;  %s1339_s10 = smov [#allocation8]   ;;  %s845_s13 = sshll.u32 %s1393_s5, 4  ;;  %s846_s13 = int_to_ptr.hbm [resolvable:$true] %s845_s13 }
   0xf   :  { %v1159_v1 = vld [vmem:[#allocation5 + $0x78] sm:$0xff]  ;;  %613 = vmatpush.bf16.msra.mxu0 %v1151_v0  ;;  %v1158_v5 = vld [vmem:[#allocation5 + $0x70] sm:$0xff]  ;;  %v1149_v8 = vld [vmem:[#allocation5 + $0x28] sm:$0xff]  ;;  %s843_s11 = sshll.u32 %s1339_s10, 4  ;;  %s844_s11 = int_to_ptr.vmem [resolvable:$true] %s843_s11 }
  0x10   :  { %v1167_v2 = vld [vmem:[#allocation5 + $0xb8] sm:$0xff]  ;;  %626 = vmatpush.bf16.msra.mxu1 %v1159_v1  ;;  %v1166_v6 = vld [vmem:[#allocation5 + $0xb0] sm:$0xff]  ;;  %v1157_v9 = vld [vmem:[#allocation5 + $0x68] sm:$0xff] }
  0x11   :  { %v1175_v3 = vld [vmem:[#allocation5 + $0xf8] sm:$0xff]  ;;  %639 = vmatpush.bf16.msra.mxu2 %v1167_v2  ;;  %v1174_v7 = vld [vmem:[#allocation5 + $0xf0] sm:$0xff]  ;;  %v1165_v10 = vld [vmem:[#allocation5 + $0xa8] sm:$0xff] }
  0x12   :  { %652 = vmatpush.bf16.msra.mxu3 %v1175_v3  ;;  %v1173_v11 = vld [vmem:[#allocation5 + $0xe8] sm:$0xff]  ;;  %v1148_v12 = vld [vmem:[#allocation5 + $0x20] sm:$0xff]  ;;  %v66_v16 = vld [vmem:[#allocation2] sm:$0xff] }
  0x13   :  { %614 = vmatpush.bf16.msra.mxu0 %v1150_v4  ;;  %v1156_v13 = vld [vmem:[#allocation5 + $0x60] sm:$0xff]  ;;  %v1147_v17 = vld [vmem:[#allocation5 + $0x18] sm:$0xff]  ;;  %198 = vst [vmem:[#allocation1] ss:$4 sm:$0xff] %v66_v16  ;;  %v1146_v21 = vld [vmem:[#allocation5 + $0x10] sm:$0xff] }
  0x14   :  { %627 = vmatpush.bf16.msra.mxu1 %v1158_v5  ;;  %v1164_v14 = vld [vmem:[#allocation5 + $0xa0] sm:$0xff]  ;;  %v1155_v18 = vld [vmem:[#allocation5 + $0x58] sm:$0xff]  ;;  %v1154_v22 = vld [vmem:[#allocation5 + $0x50] sm:$0xff] }
  0x15   :  { %640 = vmatpush.bf16.msra.mxu2 %v1166_v6  ;;  %v1172_v15 = vld [vmem:[#allocation5 + $0xe0] sm:$0xff]  ;;  %v1163_v19 = vld [vmem:[#allocation5 + $0x98] sm:$0xff]  ;;  %v1162_v23 = vld [vmem:[#allocation5 + $0x90] sm:$0xff] }
  0x16   :  { %653 = vmatpush.bf16.msra.mxu3 %v1174_v7  ;;  %v1171_v20 = vld [vmem:[#allocation5 + $0xd8] sm:$0xff]  ;;  %v1170_v24 = vld [vmem:[#allocation5 + $0xd0] sm:$0xff]  ;;  %v1145_v25 = vld [vmem:[#allocation5 + $0x8] sm:$0xff] }
  0x17   :  { %615 = vmatpush.bf16.msra.mxu0 %v1149_v8  ;;  %v1153_v26 = vld [vmem:[#allocation5 + $0x48] sm:$0xff]  ;;  %v67_v29 = vld [vmem:[#allocation2 + $0x8] sm:$0xff]  ;;  %v1144_v30 = vld [vmem:[#allocation5] sm:$0xff] }
  0x18   :  { %628 = vmatpush.bf16.msra.mxu1 %v1157_v9  ;;  %v1161_v27 = vld [vmem:[#allocation5 + $0x88] sm:$0xff]  ;;  %v1152_v31 = vld [vmem:[#allocation5 + $0x40] sm:$0xff]  ;;  %200 = vst [vmem:[#allocation1 + $0x20] ss:$4 sm:$0xff] %v67_v29  ;;  %v1183_v34 = vld [vmem:[#allocation5 + $0x138] sm:$0xff] }
  0x19   :  { %641 = vmatpush.bf16.msra.mxu2 %v1165_v10  ;;  %v1169_v28 = vld [vmem:[#allocation5 + $0xc8] sm:$0xff]  ;;  %v1160_v32 = vld [vmem:[#allocation5 + $0x80] sm:$0xff]  ;;  %v1191_v35 = vld [vmem:[#allocation5 + $0x178] sm:$0xff] }
  0x1a   :  { %654 = vmatpush.bf16.msra.mxu3 %v1173_v11  ;;  %v1168_v33 = vld [vmem:[#allocation5 + $0xc0] sm:$0xff]  ;;  %v203_v36 = vld.sshfl [vmem:[#allocation1 + $0x10] sm:$0xff pattern:$0x73625140]  ;;  %v1182_v46 = vld [vmem:[#allocation5 + $0x130] sm:$0xff] }
  0x1b   :  { %616 = vmatpush.bf16.msra.mxu0 %v1148_v12  ;;  %v201_v37 = vld.sshfl [vmem:[#allocation1] sm:$0xff pattern:$0x73625140]  ;;  %v204_v38 = vld.sshfl [vmem:[#allocation1 + $0x18] sm:$0xff pattern:$0x73625140]  ;;  %v219_v42 = vpack.c.bf16 %v203_v36, %v203_v36 }
  0x1c   :  { %629 = vmatpush.bf16.msra.mxu1 %v1156_v13  ;;  %v202_v39 = vld.sshfl [vmem:[#allocation1 + $0x8] sm:$0xff pattern:$0x73625140]  ;;  %v1199_v40 = vld [vmem:[#allocation5 + $0x1b8] sm:$0xff]  ;;  %v217_v43 = vpack.c.bf16 %v201_v37, %v201_v37  ;;  %v220_v44 = vpack.c.bf16 %v204_v38, %v204_v38  ;;  %v1181_v50 = vld [vmem:[#allocation5 + $0x128] sm:$0xff] }
  0x1d   :  { %642 = vmatpush.bf16.msra.mxu2 %v1164_v14  ;;  %v1207_v41 = vld [vmem:[#allocation5 + $0x1f8] sm:$0xff]  ;;  %v218_v45 = vpack.c.bf16 %v202_v39, %v202_v39  ;;  %v1190_v47 = vld [vmem:[#allocation5 + $0x170] sm:$0xff]  ;;  %v1189_v51 = vld [vmem:[#allocation5 + $0x168] sm:$0xff] }
  0x1e   :  { %655 = vmatpush.bf16.msra.mxu3 %v1172_v15  ;;  %v1198_v48 = vld [vmem:[#allocation5 + $0x1b0] sm:$0xff]  ;;  %v1197_v52 = vld [vmem:[#allocation5 + $0x1a8] sm:$0xff]  ;;  %v1180_v54 = vld [vmem:[#allocation5 + $0x120] sm:$0xff] }
  0x1f   :  { %617 = vmatpush.bf16.msra.mxu0 %v1147_v17  ;;  %v1206_v49 = vld [vmem:[#allocation5 + $0x1f0] sm:$0xff]  ;;  %v1205_v53 = vld [vmem:[#allocation5 + $0x1e8] sm:$0xff]  ;;  %v1188_v55 = vld [vmem:[#allocation5 + $0x160] sm:$0xff] }
  0x20   :  { %630 = vmatpush.bf16.msra.mxu1 %v1155_v18  ;;  %v1196_v56 = vld [vmem:[#allocation5 + $0x1a0] sm:$0xff]  ;;  %v1179_v58 = vld [vmem:[#allocation5 + $0x118] sm:$0xff]  ;;  %v1178_v62 = vld [vmem:[#allocation5 + $0x110] sm:$0xff] }
  0x21   :  { %643 = vmatpush.bf16.msra.mxu2 %v1163_v19  ;;  %v1204_v57 = vld [vmem:[#allocation5 + $0x1e0] sm:$0xff]  ;;  %v1187_v59 = vld [vmem:[#allocation5 + $0x158] sm:$0xff]  ;;  %v1186_v63 = vld [vmem:[#allocation5 + $0x150] sm:$0xff] }
  0x22   :  { %656 = vmatpush.bf16.msra.mxu3 %v1171_v20  ;;  %v1195_v60 = vld [vmem:[#allocation5 + $0x198] sm:$0xff]  ;;  %v1194_v0 = vld [vmem:[#allocation5 + $0x190] sm:$0xff]  ;;  %v1177_v2 = vld [vmem:[#allocation5 + $0x108] sm:$0xff] }
  0x23   :  { %618 = vmatpush.bf16.msra.mxu0 %v1146_v21  ;;  %v1203_v61 = vld [vmem:[#allocation5 + $0x1d8] sm:$0xff]  ;;  %v1202_v1 = vld [vmem:[#allocation5 + $0x1d0] sm:$0xff]  ;;  %v1185_v3 = vld [vmem:[#allocation5 + $0x148] sm:$0xff] }
  0x24   :  { %631 = vmatpush.bf16.msra.mxu1 %v1154_v22  ;;  %v1193_v4 = vld [vmem:[#allocation5 + $0x188] sm:$0xff]  ;;  %v1176_v6 = vld [vmem:[#allocation5 + $0x100] sm:$0xff]  ;;  %v206_v11 = vld.sshfl [vmem:[#allocation1 + $0x28] sm:$0xff pattern:$0x73625140] }
  0x25   :  { %644 = vmatpush.bf16.msra.mxu2 %v1162_v23  ;;  %v1201_v5 = vld [vmem:[#allocation5 + $0x1c8] sm:$0xff]  ;;  %v1184_v7 = vld [vmem:[#allocation5 + $0x140] sm:$0xff]  ;;  %v207_v12 = vld.sshfl [vmem:[#allocation1 + $0x30] sm:$0xff pattern:$0x73625140]  ;;  %v222_v15 = vpack.c.bf16 %v206_v11, %v206_v11 }
  0x26   :  { %657 = vmatpush.bf16.msra.mxu3 %v1170_v24  ;;  %v1192_v8 = vld [vmem:[#allocation5 + $0x180] sm:$0xff]  ;;  %v205_v10 = vld.sshfl [vmem:[#allocation1 + $0x20] sm:$0xff pattern:$0x73625140]  ;;  %v223_v16 = vpack.c.bf16 %v207_v12, %v207_v12  ;;  %v1215_v23 = vld [vmem:[#allocation7 + $0x38] sm:$0xff] }
  0x27   :  { %619 = vmatpush.bf16.msra.mxu0 %v1145_v25  ;;  %v1200_v9 = vld [vmem:[#allocation5 + $0x1c0] sm:$0xff]  ;;  %v221_v14 = vpack.c.bf16 %v205_v10, %v205_v10  ;;  %v1214_v25 = vld [vmem:[#allocation7 + $0x30] sm:$0xff]  ;;  %v1213_v29 = vld [vmem:[#allocation7 + $0x28] sm:$0xff] }
  0x28   :  { %632 = vmatpush.bf16.msra.mxu1 %v1153_v26  ;;  %v208_v13 = vld.sshfl [vmem:[#allocation1 + $0x38] sm:$0xff pattern:$0x73625140]  ;;  %v1222_v26 = vld [vmem:[%s1390_s2] ss:$0 sm:$0xff] }
  0x29   :  { %645 = vmatpush.bf16.msra.mxu2 %v1161_v27  ;;  %v224_v17 = vpack.c.bf16 %v208_v13, %v208_v13 }
  0x2a   :  { %658 = vmatpush.bf16.msra.mxu3 %v1169_v28 }
  0x2b   :  { %620 = vmatpush.bf16.msra.mxu0 %v1144_v30 }
  0x2c   :  { %633 = vmatpush.bf16.msra.mxu1 %v1152_v31  ;;  %v1212_v31 = vld [vmem:[#allocation7 + $0x20] sm:$0xff] }
  0x2d   :  { %646 = vmatpush.bf16.msra.mxu2 %v1160_v32 }
  0x2e   :  { %659 = vmatpush.bf16.msra.mxu3 %v1168_v33  ;;  %621 = vmatmul.bf16.vlgmr.msra.gmra.mxu0 %v217_v43  ;;  %v1211_v33 = vld [vmem:[#allocation7 + $0x18] sm:$0xff] }
  0x2f   :  { %665 = vmatpush.bf16.msrb.mxu0 %v1183_v34  ;;  %634 = vmatmul.bf16.vlgmr.msra.gmra.mxu1 %v218_v45 }
  0x30   :  { %678 = vmatpush.bf16.msrb.mxu1 %v1191_v35  ;;  %647 = vmatmul.bf16.vlgmr.msra.gmra.mxu2 %v219_v42  ;;  %v1210_v35 = vld [vmem:[#allocation7 + $0x10] sm:$0xff] }
  0x31   :  { %691 = vmatpush.bf16.msrb.mxu2 %v1199_v40  ;;  %660 = vmatmul.bf16.vlgmr.msra.gmra.mxu3 %v220_v44  ;;  %v1209_v40 = vld [vmem:[#allocation7 + $0x8] sm:$0xff] }
  0x32   :  { %704 = vmatpush.bf16.msrb.mxu3 %v1207_v41  ;;  %v1208_v41 = vld [vmem:[#allocation7] sm:$0xff] }
  0x33   :  { %666 = vmatpush.bf16.msrb.mxu0 %v1182_v46 }
  0x34   :  { %679 = vmatpush.bf16.msrb.mxu1 %v1190_v47 }
  0x35   :  { %692 = vmatpush.bf16.msrb.mxu2 %v1198_v48 }
  0x36   :  { %705 = vmatpush.bf16.msrb.mxu3 %v1206_v49 }
  0x37   :  { %667 = vmatpush.bf16.msrb.mxu0 %v1181_v50 }
  0x38   :  { %680 = vmatpush.bf16.msrb.mxu1 %v1189_v51 }
  0x39   :  { %693 = vmatpush.bf16.msrb.mxu2 %v1197_v52 }
  0x3a   :  { %706 = vmatpush.bf16.msrb.mxu3 %v1205_v53 }
  0x3b   :  { %668 = vmatpush.bf16.msrb.mxu0 %v1180_v54 }
  0x3c   :  { %681 = vmatpush.bf16.msrb.mxu1 %v1188_v55 }
  0x3d   :  { %694 = vmatpush.bf16.msrb.mxu2 %v1196_v56 }
  0x3e   :  { %707 = vmatpush.bf16.msrb.mxu3 %v1204_v57 }
  0x3f   :  { %669 = vmatpush.bf16.msrb.mxu0 %v1179_v58 }
  0x40   :  { %682 = vmatpush.bf16.msrb.mxu1 %v1187_v59 }
  0x41   :  { %695 = vmatpush.bf16.msrb.mxu2 %v1195_v60 }
  0x42   :  { %708 = vmatpush.bf16.msrb.mxu3 %v1203_v61 }
  0x43   :  { %670 = vmatpush.bf16.msrb.mxu0 %v1178_v62 }
  0x44   :  { %683 = vmatpush.bf16.msrb.mxu1 %v1186_v63 }
  0x45   :  { %696 = vmatpush.bf16.msrb.mxu2 %v1194_v0 }
  0x46   :  { %709 = vmatpush.bf16.msrb.mxu3 %v1202_v1 }
  0x47   :  { %671 = vmatpush.bf16.msrb.mxu0 %v1177_v2  ;;  %v1223_v2 = vld [vmem:[%s1392_s4] ss:$0 sm:$0xff] }
  0x48   :  { %684 = vmatpush.bf16.msrb.mxu1 %v1185_v3 }
  0x49   :  { %697 = vmatpush.bf16.msrb.mxu2 %v1193_v4 }
  0x4a   :  { %710 = vmatpush.bf16.msrb.mxu3 %v1201_v5 }
  0x4b   :  { %672 = vmatpush.bf16.msrb.mxu0 %v1176_v6 }
  0x4c   :  { %685 = vmatpush.bf16.msrb.mxu1 %v1184_v7 }
  0x4d   :  { %698 = vmatpush.bf16.msrb.mxu2 %v1192_v8 }
  0x4e   :  { %711 = vmatpush.bf16.msrb.mxu3 %v1200_v9  ;;  %673 = vmatmul.bf16.vlgmr.msrb.gmra.mxu0 %v221_v14 }
  0x4f   :  { %686 = vmatmul.bf16.vlgmr.msrb.gmra.mxu1 %v222_v15  ;;  %805 = vmatpush.bf16.msra.mxu0 %v1215_v23 }
  0x50   :  { %699 = vmatmul.bf16.vlgmr.msrb.gmra.mxu2 %v223_v16 }
  0x51   :  { %712 = vmatmul.bf16.vlgmr.msrb.gmra.mxu3 %v224_v17 }
  0x53   :  { %806 = vmatpush.bf16.msra.mxu0 %v1214_v25 }
  0x57   :  { %807 = vmatpush.bf16.msra.mxu0 %v1213_v29 }
  0x5b   :  { %808 = vmatpush.bf16.msra.mxu0 %v1212_v31 }
  0x5f   :  { %809 = vmatpush.bf16.msra.mxu0 %v1211_v33 }
  0x63   :  { %810 = vmatpush.bf16.msra.mxu0 %v1210_v35 }
  0x67   :  { %811 = vmatpush.bf16.msra.mxu0 %v1209_v40 }
  0x6b   :  { %812 = vmatpush.bf16.msra.mxu0 %v1208_v41 }
  0xab   :  { %v622_v18 = vpop.f32.mrf.mxu0 }
  0xac   :  { %v635_v19 = vpop.f32.mrf.mxu1  ;;  %v623_v30 = vadd.f32 %v1222_v26, %v622_v18 }
  0xae   :  { %v636_v32 = vadd.f32 %v635_v19, %v623_v30 }
  0xb3   :  { %v648_v20 = vpop.f32.mrf.mxu2  ;;  %v624_v22 = vpop.f32.mrf.mxu0 }
  0xb4   :  { %v661_v21 = vpop.f32.mrf.mxu3  ;;  %v637_v24 = vpop.f32.mrf.mxu1  ;;  %v649_v34 = vadd.f32 %v648_v20, %v636_v32 }
  0xb6   :  { %v662_v36 = vadd.f32 %v661_v21, %v649_v34 }
  0xbb   :  { %v650_v27 = vpop.f32.mrf.mxu2 }
  0xbc   :  { %v663_v28 = vpop.f32.mrf.mxu3 }
  0xcb   :  { %v674_v37 = vpop.f32.mrf.mxu0 }
  0xcc   :  { %v687_v38 = vpop.f32.mrf.mxu1  ;;  %v675_v39 = vadd.f32 %v674_v37, %v662_v36 }
  0xce   :  { %v688_v42 = vadd.f32 %v687_v38, %v675_v39 }
  0xd3   :  { %v700_v43 = vpop.f32.mrf.mxu2  ;;  %v676_v46 = vpop.f32.mrf.mxu0 }
  0xd4   :  { %v713_v44 = vpop.f32.mrf.mxu3  ;;  %v701_v45 = vadd.f32 %v700_v43, %v688_v42  ;;  %v689_v47 = vpop.f32.mrf.mxu1 }
  0xd6   :  { %v714_v48 = vadd.f32 %v713_v44, %v701_v45 }
  0xd8   :  { %v717_v49 = vsub.f32 0.0, %v714_v48 }
  0xda   :  { %v718_v50 = vmul.f32 1.442695, %v717_v49 }
  0xdb   :  { %v702_v51 = vpop.f32.mrf.mxu2 }
  0xdc   :  { %v715_v52 = vpop.f32.mrf.mxu3  ;;  %1224 = vpow2.f32 %v718_v50 }
  0xe2   :  { %v1225_v53 = vpop.eup %1224 }
  0xe3   :  { %v720_v54 = vadd.f32 1.0, %v1225_v53 }
  0xe5   :  { %1226 = vrcp.f32 %v720_v54  ;;  %v732_v58 = vand.u32 2147483648, %v720_v54  ;;  %v730_v60 = vand.u32 2147483647, %v720_v54  ;;  %vm726_vm1 = vweird.f32 %v720_v54 }
  0xe7   :  { %v733_v62 = vor.u32 1.1754944e-38, %v732_v58  ;;  %vm731_vm3 = vcmp.eq.f32.partialorder %v730_v60, 8.507059e+37 }
  0xeb   :  { %v1227_v55 = vpop.eup %1226 }
  0xec   :  { %v722_v56 = vmul.f32 %v1227_v55, %v720_v54  ;;  %vm727_vm0 = vweird.f32 %v1227_v55 }
  0xed   :  { %vm728_vm2 = vmor %vm726_vm1, %vm727_vm0 }
  0xee   :  { %v723_v57 = vsub.f32 1.0, %v722_v56 }
  0xf0   :  { %v724_v59 = vmul.f32 %v1227_v55, %v723_v57 }
  0xf2   :  { %v725_v61 = vadd.f32 %v1227_v55, %v724_v59 }
  0xf4   :  { %v729_v63 = vsel %vm728_vm2, %v1227_v55, %v725_v61 }
  0xf5   :  { %v734_v0 = vsel %vm731_vm3, %v733_v62, %v729_v63 }
  0xf6   :  { %v752_v1 = vpack.c.bf16 %v734_v0, %v734_v0 }
  0xf8   :  { %813 = vmatmul.bf16.vlgmr.msra.gmra.mxu0 %v752_v1 }
 0x175   :  { %v814_v3 = vpop.f32.mrf.mxu0 }
 0x176   :  { %v815_v4 = vadd.f32 %v1223_v2, %v814_v3 }
 0x178   :  { %v818_v5 = vsub.f32 0.0, %v815_v4 }
 0x17a   :  { %v819_v6 = vmul.f32 1.442695, %v818_v5 }
 0x17c   :  { %1228 = vpow2.f32 %v819_v6 }
 0x17d   :  { %v816_v7 = vpop.f32.mrf.mxu0 }
 0x182   :  { %v1229_v8 = vpop.eup %1228 }
 0x183   :  { %v821_v9 = vadd.f32 1.0, %v1229_v8 }
 0x185   :  { %1230 = vrcp.f32 %v821_v9  ;;  %v833_v13 = vand.u32 2147483648, %v821_v9  ;;  %v831_v15 = vand.u32 2147483647, %v821_v9  ;;  %vm827_vm5 = vweird.f32 %v821_v9 }
 0x187   :  { %v834_v17 = vor.u32 1.1754944e-38, %v833_v13  ;;  %vm832_vm7 = vcmp.eq.f32.partialorder %v831_v15, 8.507059e+37 }
 0x18b   :  { %v1231_v10 = vpop.eup %1230 }
 0x18c   :  { %v823_v11 = vmul.f32 %v1231_v10, %v821_v9  ;;  %vm828_vm4 = vweird.f32 %v1231_v10 }
 0x18d   :  { %vm829_vm6 = vmor %vm827_vm5, %vm828_vm4 }
 0x18e   :  { %v824_v12 = vsub.f32 1.0, %v823_v11 }
 0x190   :  { %v825_v14 = vmul.f32 %v1231_v10, %v824_v12 }
 0x192   :  { %v826_v16 = vadd.f32 %v1231_v10, %v825_v14 }
 0x194   :  { %v830_v18 = vsel %vm829_vm6, %v1231_v10, %v826_v16 }
 0x195   :  { %v835_v19 = vsel %vm832_vm7, %v834_v17, %v830_v18 }
 0x196   :  { %837 = vst [vmem:[#allocation8] sm:$0x3] %v835_v19 }
 0x197   :  { %848 = dma.vmem_to_hbm [thread:$0]  %s844_s11, 32, %s846_s13, [#allocation4]  }
 0x198   :  { %1332 = dma.done.wait [#allocation4], 32  }
 0x199   :  { %1333 = vsyncadd [#allocation4], 4294967264 }
 0x19a   :  { %853 = vsyncpa [#allocation3], 1 }
 0x19b   :  { %854 = vsyncpa [#allocation6], 1 }
 0x19c   :  { %855 = vsyncpa [#allocation4], 1 }

</bundles_post_ra>
